<compile_context>
chip_gen: v7x
topology: tpu7x:2x2x1
jax: 0.10.0
libtpu: 0.0.40
codegen_flags: <defaults>
</compile_context>

<pallas_src>
import functools

import jax
import jax.numpy as jnp
from jax.experimental import pallas as pl
from jax.experimental.pallas import tpu as pltpu


def _energy_loss_kernel(gt_sq_ref, pred_sq_ref, gt_ref, absdiff_ref, sq_ref):
    # Grid: (K, B, R). One step = one (1, 1, F_TILE, T) block of channel k.
    # absdiff_ref / sq_ref: (1, 8, 128) f32 output blocks, resident across the
    # (b, r) reduction axes (output index_map only depends on k) — used
    # directly as accumulators.
    b = pl.program_id(1)
    r = pl.program_id(2)

    @pl.when(jnp.logical_and(b == 0, r == 0))
    def _init():
        absdiff_ref[...] = jnp.zeros_like(absdiff_ref)
        sq_ref[...] = jnp.zeros_like(sq_ref)

    gt_sq = gt_sq_ref[...].astype(jnp.float32)
    pr_sq = pred_sq_ref[...].astype(jnp.float32)
    g = gt_ref[...].astype(jnp.float32)

    absdiff_ref[...] += jnp.sum(jnp.abs(pr_sq - gt_sq))
    sq_ref[...] += jnp.sum(g * g)


def _choose_f_tile(F, T, itemsize, tile_budget_bytes=4 * 1024 * 1024):
    """Largest F-tile that (a) divides F, (b) is a multiple of 8 (or == F),
    and (c) keeps one input block under ~4 MiB (3 inputs x 2 buffers < 32 MiB,
    with headroom for v7x's smaller VMEM)."""
    max_rows = max(1, tile_budget_bytes // max(1, T * itemsize))
    for rows in range(min(F, max_rows), 0, -1):
        if F % rows == 0 and (rows % 8 == 0 or rows == F):
            return rows
    # TODO(synk): pad F when it has no suitable divisor under the VMEM budget.
    return F


def _per_channel_sums(gt_mags_sq, pred_mags_sq, gt_mags):
    """Returns (sum |pred_sq - gt_sq| per channel / N, sum gt_mags^2 per channel)."""
    B, K, F, T = gt_mags_sq.shape
    itemsize = jnp.dtype(gt_mags_sq.dtype).itemsize
    f_tile = _choose_f_tile(F, T, itemsize)
    R = F // f_tile

    # Index the original [B, K, F, T] layout directly; channel selection is a
    # pure index_map lookup — no transposes, no extra HBM traffic.
    in_spec = pl.BlockSpec((1, 1, f_tile, T), lambda k, b, r: (b, k, r, 0))
    # Lane-dense (8, 128) per-channel output block (satisfies tiling rules,
    # unmasked stores); only element [k, 0, 0] is consumed by the wrapper.
    out_spec = pl.BlockSpec((1, 8, 128), lambda k, b, r: (k, 0, 0))

    absdiff, sq = pl.pallas_call(
        _energy_loss_kernel,
        out_shape=(
            jax.ShapeDtypeStruct((K, 8, 128), jnp.float32),
            jax.ShapeDtypeStruct((K, 8, 128), jnp.float32),
        ),
        grid_spec=pltpu.PrefetchScalarGridSpec(
            num_scalar_prefetch=0,
            grid=(K, B, R),
            in_specs=[in_spec, in_spec, in_spec],
            out_specs=(out_spec, out_spec),
        ),
        compiler_params=pltpu.CompilerParams(
            # K is independent -> parallel (megacore on v7x); (B, R) are the
            # reduction axes accumulating into the resident output blocks.
            dimension_semantics=("parallel", "arbitrary", "arbitrary"),
            vmem_limit_bytes=32 * 1024 * 1024,
        ),
    )(gt_mags_sq, pred_mags_sq, gt_mags)

    n_elems = jnp.float32(B * F * T)
    l1_per_ch = absdiff[:, 0, 0] / n_elems          # torch.nn.L1Loss() -> mean
    sumsq_per_ch = sq[:, 0, 0]                       # gt_mags[:, k].pow(2).sum()
    return l1_per_ch, sumsq_per_ch


@functools.partial(jax.jit, static_argnames=("power",))
def energy_based_loss_instantwise(gt_mags_sq, pred_mags_sq, gt_mags, *, power=1):
    K = gt_mags_sq.shape[1]
    l1c, ssq = _per_channel_sums(gt_mags_sq, pred_mags_sq, gt_mags)
    if K == 2:
        l1, l2 = l1c[0], l1c[1]
        w1 = (ssq[1] / ssq[0]) ** power
        w2 = 1.0
        l11 = w1 * l1 + w2 * l2
        return [l1, l2, l11]
    elif K == 4:
        l1, l2, l3, l4 = l1c[0], l1c[1], l1c[2], l1c[3]
        w1 = (ssq[2] / ssq[0]) ** power
        w2 = (ssq[2] / ssq[1]) ** power
        w3 = 1.0
        w4 = (ssq[2] / ssq[3]) ** power
        l11 = w1 * l1 + w2 * l2
        l22 = w3 * l3 + w4 * l4
        return [l1, l2, l3, l4, l11 + l22]
    else:
        raise ValueError(f"EnergyBasedLossInstantwise expects K in (2, 4), got {K}")


def _reference(gt_mags_sq, pred_mags_sq, gt_mags, K, power=1):
    # pure-JAX reference mirroring the PyTorch module
    def L1(a, b):
        return jnp.mean(jnp.abs(a - b))

    def ssq(c):
        return jnp.sum(gt_mags[:, c] ** 2)

    if K == 2:
        l1 = L1(pred_mags_sq[:, 0], gt_mags_sq[:, 0])
        l2 = L1(pred_mags_sq[:, 1], gt_mags_sq[:, 1])
        w1 = (ssq(1) / ssq(0)) ** power
        return [l1, l2, w1 * l1 + l2]
    else:
        l1 = L1(pred_mags_sq[:, 0], gt_mags_sq[:, 0])
        l2 = L1(pred_mags_sq[:, 1], gt_mags_sq[:, 1])
        l3 = L1(pred_mags_sq[:, 2], gt_mags_sq[:, 2])
        l4 = L1(pred_mags_sq[:, 3], gt_mags_sq[:, 3])
        w1 = (ssq(2) / ssq(0)) ** power
        w2 = (ssq(2) / ssq(1)) ** power
        w4 = (ssq(2) / ssq(3)) ** power
        return [l1, l2, l3, l4, (w1 * l1 + w2 * l2) + (l3 + w4 * l4)]


if __name__ == "__main__":
    key = jax.random.PRNGKey(0)
    B, F, T = 2, 16, 128
    power = 1

    ok = True
    for K in (2, 4):
        k1, k2, key = jax.random.split(key, 3)
        gt_mags = jnp.abs(jax.random.normal(k1, (B, K, F, T), dtype=jnp.float32))
        pred_mags = jnp.abs(jax.random.normal(k2, (B, K, F, T), dtype=jnp.float32))
        gt_mags_sq = gt_mags ** 2
        pred_mags_sq = pred_mags ** 2

        out = energy_based_loss_instantwise(
            gt_mags_sq, pred_mags_sq, gt_mags, power=power
        )
        out = [jax.block_until_ready(o) for o in out]
        ref = _reference(gt_mags_sq, pred_mags_sq, gt_mags, K, power)

        for o, r in zip(out, ref):
            if not jnp.allclose(o, r, rtol=1e-4, atol=1e-4):
                ok = False

    if ok:
        print("KERNEL_OK")
    else:
        print("MISMATCH")
</pallas_src>

<mosaic_0001>
module attributes {stable_mosaic.version = 11 : i64} {
  func.func @_energy_loss_kernel(%arg0: i32, %arg1: i32, %arg2: i32, %arg3: memref<1x1x16x128xf32, #tpu.memory_space<vmem>>, %arg4: memref<1x1x16x128xf32, #tpu.memory_space<vmem>>, %arg5: memref<1x1x16x128xf32, #tpu.memory_space<vmem>>, %arg6: memref<1x8x128xf32, #tpu.memory_space<vmem>>, %arg7: memref<1x8x128xf32, #tpu.memory_space<vmem>>) attributes {dimension_semantics = [#tpu.dimension_semantics<parallel>, #tpu.dimension_semantics<arbitrary>, #tpu.dimension_semantics<arbitrary>], iteration_bounds = array<i64: 2, 2, 1>, scalar_prefetch = 0 : i64, scratch_operands = 0 : i64, tpu.core_type = #tpu.core_type<tc>, window_params = [{transform_indices = @transform_0, window_bounds = array<i64: 1, 1, 16, 128>}, {transform_indices = @transform_1, window_bounds = array<i64: 1, 1, 16, 128>}, {transform_indices = @transform_2, window_bounds = array<i64: 1, 1, 16, 128>}, {transform_indices = @transform_3, window_bounds = array<i64: 1, 8, 128>}, {transform_indices = @transform_4, window_bounds = array<i64: 1, 8, 128>}]} {
    %c0_i32 = arith.constant 0 : i32
    %0 = arith.cmpi eq, %arg1, %c0_i32 : i32
    %c0_i32_0 = arith.constant 0 : i32
    %1 = arith.cmpi eq, %arg2, %c0_i32_0 : i32
    %2 = arith.andi %0, %1 : i1
    %3 = arith.extui %2 : i1 to i32
    %c0_i32_1 = arith.constant 0 : i32
    %4 = arith.cmpi ne, %3, %c0_i32_1 : i32
    scf.if %4 {
      %cst_26 = arith.constant 0.000000e+00 : f32
      %27 = vector.broadcast %cst_26 : f32 to vector<1x8x128xf32>
      %c0_27 = arith.constant 0 : index
      %c0_28 = arith.constant 0 : index
      %c0_29 = arith.constant 0 : index
      %28 = vector.load %arg6[%c0_27, %c0_28, %c0_29] : memref<1x8x128xf32, #tpu.memory_space<vmem>>, vector<1x8x128xf32>
      tpu.vector_store %arg6[%c0_27, %c0_28, %c0_29], %27 {strides = array<i32>} : memref<1x8x128xf32, #tpu.memory_space<vmem>>, vector<1x8x128xf32>,
      %cst_30 = arith.constant 0.000000e+00 : f32
      %29 = vector.broadcast %cst_30 : f32 to vector<1x8x128xf32>
      %c0_31 = arith.constant 0 : index
      %c0_32 = arith.constant 0 : index
      %c0_33 = arith.constant 0 : index
      %30 = vector.load %arg7[%c0_31, %c0_32, %c0_33] : memref<1x8x128xf32, #tpu.memory_space<vmem>>, vector<1x8x128xf32>
      tpu.vector_store %arg7[%c0_31, %c0_32, %c0_33], %29 {strides = array<i32>} : memref<1x8x128xf32, #tpu.memory_space<vmem>>, vector<1x8x128xf32>,
    } else {
    }
    %c0 = arith.constant 0 : index
    %c0_2 = arith.constant 0 : index
    %c0_3 = arith.constant 0 : index
    %c0_4 = arith.constant 0 : index
    %5 = vector.load %arg3[%c0, %c0_2, %c0_3, %c0_4] : memref<1x1x16x128xf32, #tpu.memory_space<vmem>>, vector<1x1x16x128xf32>
    %c0_5 = arith.constant 0 : index
    %c0_6 = arith.constant 0 : index
    %c0_7 = arith.constant 0 : index
    %c0_8 = arith.constant 0 : index
    %6 = vector.load %arg4[%c0_5, %c0_6, %c0_7, %c0_8] : memref<1x1x16x128xf32, #tpu.memory_space<vmem>>, vector<1x1x16x128xf32>
    %c0_9 = arith.constant 0 : index
    %c0_10 = arith.constant 0 : index
    %c0_11 = arith.constant 0 : index
    %c0_12 = arith.constant 0 : index
    %7 = vector.load %arg5[%c0_9, %c0_10, %c0_11, %c0_12] : memref<1x1x16x128xf32, #tpu.memory_space<vmem>>, vector<1x1x16x128xf32>
    %c0_13 = arith.constant 0 : index
    %c0_14 = arith.constant 0 : index
    %c0_15 = arith.constant 0 : index
    %8 = vector.load %arg6[%c0_13, %c0_14, %c0_15] : memref<1x8x128xf32, #tpu.memory_space<vmem>>, vector<1x8x128xf32>
    %9 = arith.subf %6, %5 : vector<1x1x16x128xf32>
    %10 = math.absf %9 : vector<1x1x16x128xf32>
    %11 = vector.shape_cast %10 : vector<1x1x16x128xf32> to vector<1x1x1x16x128xf32>
    %cst = arith.constant dense<0.000000e+00> : vector<1xf32>
    %12 = vector.multi_reduction <add>, %11, %cst [1, 2, 3, 4] : vector<1x1x1x16x128xf32> to vector<1xf32>
    %13 = vector.shape_cast %12 : vector<1xf32> to vector<1x1x1x1x1xf32>
    %14 = vector.extract %13[0, 0, 0, 0, 0] : f32 from vector<1x1x1x1x1xf32>
    %15 = vector.broadcast %14 : f32 to vector<1x8x128xf32>
    %16 = arith.addf %8, %15 : vector<1x8x128xf32>
    %c0_16 = arith.constant 0 : index
    %c0_17 = arith.constant 0 : index
    %c0_18 = arith.constant 0 : index
    %17 = vector.load %arg6[%c0_16, %c0_17, %c0_18] : memref<1x8x128xf32, #tpu.memory_space<vmem>>, vector<1x8x128xf32>
    tpu.vector_store %arg6[%c0_16, %c0_17, %c0_18], %16 {strides = array<i32>} : memref<1x8x128xf32, #tpu.memory_space<vmem>>, vector<1x8x128xf32>,
    %c0_19 = arith.constant 0 : index
    %c0_20 = arith.constant 0 : index
    %c0_21 = arith.constant 0 : index
    %18 = vector.load %arg7[%c0_19, %c0_20, %c0_21] : memref<1x8x128xf32, #tpu.memory_space<vmem>>, vector<1x8x128xf32>
    %19 = arith.mulf %7, %7 : vector<1x1x16x128xf32>
    %20 = vector.shape_cast %19 : vector<1x1x16x128xf32> to vector<1x1x1x16x128xf32>
    %cst_22 = arith.constant dense<0.000000e+00> : vector<1xf32>
    %21 = vector.multi_reduction <add>, %20, %cst_22 [1, 2, 3, 4] : vector<1x1x1x16x128xf32> to vector<1xf32>
    %22 = vector.shape_cast %21 : vector<1xf32> to vector<1x1x1x1x1xf32>
    %23 = vector.extract %22[0, 0, 0, 0, 0] : f32 from vector<1x1x1x1x1xf32>
    %24 = vector.broadcast %23 : f32 to vector<1x8x128xf32>
    %25 = arith.addf %18, %24 : vector<1x8x128xf32>
    %c0_23 = arith.constant 0 : index
    %c0_24 = arith.constant 0 : index
    %c0_25 = arith.constant 0 : index
    %26 = vector.load %arg7[%c0_23, %c0_24, %c0_25] : memref<1x8x128xf32, #tpu.memory_space<vmem>>, vector<1x8x128xf32>
    tpu.vector_store %arg7[%c0_23, %c0_24, %c0_25], %25 {strides = array<i32>} : memref<1x8x128xf32, #tpu.memory_space<vmem>>, vector<1x8x128xf32>,
    return
  }
  func.func @transform_0(%arg0: i32, %arg1: i32, %arg2: i32) -> (i32, i32, i32, i32) {
    %c0_i32 = arith.constant 0 : i32
    %c0_i32_0 = arith.constant 0 : i32
    return %arg1, %arg0, %arg2, %c0_i32 : i32, i32, i32, i32
  }
  func.func @transform_1(%arg0: i32, %arg1: i32, %arg2: i32) -> (i32, i32, i32, i32) {
    %c0_i32 = arith.constant 0 : i32
    %c0_i32_0 = arith.constant 0 : i32
    return %arg1, %arg0, %arg2, %c0_i32 : i32, i32, i32, i32
  }
  func.func @transform_2(%arg0: i32, %arg1: i32, %arg2: i32) -> (i32, i32, i32, i32) {
    %c0_i32 = arith.constant 0 : i32
    %c0_i32_0 = arith.constant 0 : i32
    return %arg1, %arg0, %arg2, %c0_i32 : i32, i32, i32, i32
  }
  func.func @transform_3(%arg0: i32, %arg1: i32, %arg2: i32) -> (i32, i32, i32) {
    %c0_i32 = arith.constant 0 : i32
    %c0_i32_0 = arith.constant 0 : i32
    %c0_i32_1 = arith.constant 0 : i32
    return %arg0, %c0_i32, %c0_i32_0 : i32, i32, i32
  }
  func.func @transform_4(%arg0: i32, %arg1: i32, %arg2: i32) -> (i32, i32, i32) {
    %c0_i32 = arith.constant 0 : i32
    %c0_i32_0 = arith.constant 0 : i32
    %c0_i32_1 = arith.constant 0 : i32
    return %arg0, %c0_i32, %c0_i32_0 : i32, i32, i32
  }
}

</mosaic_0001>

<bundles_post_ra>
// kernel: energy_based_loss_instantwise.1
= control target key start
LH: loop header
LB: loop body
LE: loop exit
PB: predicated region body
PF: predicated region fallthrough
CT: control target
= control target key end

     0   :  { %s1138_s0 = inlined_call_operand.hbm [shape: f32[2,2,16,128], index: 0, kind: input, shape index: {}]   ;;  %s1139_s1 = inlined_call_operand.hbm [shape: f32[2,2,16,128], index: 1, kind: input, shape index: {}]   ;;  %s1140_s2 = inlined_call_operand.hbm [shape: f32[2,2,16,128], index: 2, kind: input, shape index: {}]   ;;  %s1141_s3 = inlined_call_operand.vmem [shape: f32[2,8,128], index: 3, kind: output, shape index: {0}]   ;;  %s1142_s4 = inlined_call_operand.vmem [shape: f32[2,8,128], index: 4, kind: output, shape index: {1}]  }
   0x1   :  { %1153 = sst [smem:[#allocation12_spill]] %s1139_s1 }
   0x2   :  { %10 = vsyncpa [#allocation3], 0 }
   0x3   :  { %12 = vsyncpa [#allocation3 + $0x1], 0 }
   0x4   :  { %13 = vsyncpa [#allocation5], 0 }
   0x5   :  { %15 = vsyncpa [#allocation5 + $0x1], 0  ;;  %s873_s15 = smov 0   ;;  %s875_s16 = smov 0  }
   0x6   :  { %s877_s17 = smov 0   ;;  %s879_s18 = smov 0  }
   0x7   :  { %s881_s19 = smov 0   ;;  %s883_s20 = smov 0  }
   0x8   :  { %s885_s21 = smov 0   ;;  %s887_s22 = smov 0  }
   0x9 LB: > { %1154 = sst [smem:[#allocation9_spill]] %s836_s21  ;;  %s1143_s23 = sadd.s32 4294967295, %s840_s22   ;;  %s840_s22 = sphi %s887_s22, %s21_s22   ;;  %s836_s21 = sphi %s885_s21, %s1173_s21   ;;  %s832_s20 = sphi %s883_s20, %s1178_s20   ;;  %s828_s19 = sphi %s881_s19, %s1171_s19   ;;  %s824_s18 = sphi %s879_s18, %s1177_s18   ;;  %s820_s17 = sphi %s877_s17, %s1176_s17   ;;  %s816_s16 = sphi %s875_s16, %s1175_s16   ;;  %s812_s15 = sphi %s873_s15, %s1174_s15  }
   0xa   : > { %s36_s24 = sadd.s32 1, %s832_s20  ;;  %s40_s25 = sadd.s32 1, %s836_s21 }
   0xb   : > { %p38_p0 = scmp.ge.s32.totalorder %s36_s24, 2  ;;  %s51_s26 = sadd.s32 1, %s820_s17 }
   0xc   : > { %p58_p1 = scmp.ne.s32.totalorder %s820_s17, %s816_s16  ;;  %p59_p2 = scmp.eq.s32.totalorder %s840_s22, 0 }
   0xd   : > { %s1180_s24 = smov (%p38_p0, %s36_s24), 0  ;;  %s1182_s25 = smov (!%p38_p0, %s40_s25), %s836_s21 }
   0xe   : > { %1155 = sst [smem:[#allocation10_spill]] %s1180_s24  ;;  %s44_s27 = ssub.s32 %s832_s20, %s1180_s24 }
   0xf   : > { %p42_p3 = scmp.ge.s32.totalorder %s1182_s25, 2  ;;  %p64_p4 = scmp.ne.s32.totalorder %s816_s16, %s812_s15 }
  0x10   : > { %p924_p5 = por %p59_p2, %p58_p1  ;;  %p65_p6 = scmp.eq.s32.totalorder %s1143_s23, 0 }
  0x11   : > { %s1184_s25 = smov (%p42_p3, %s1182_s25), 0  ;;  %p612_p8 = scmp.lt.s32.totalorder %s840_s22, 4 }
  0x12   : > { %1157 = sst [smem:[#allocation11_spill]] %s1184_s25  ;;  %p932_p7 = por %p65_p6, %p64_p4 }
  0x13   : > { %s45_s30 = ssub.s32 %s836_s21, %s1184_s25  ;;  %s1145_s6 = sand.u32 1, %s820_s17  }
  0x14   : > { %s1158_s29 = scalar_select %p932_p7, 1, 0 }
  0x15   : > { %s46_s5 = sor.u32 %s45_s30, %s44_s27  ;;  %s942_s7 = sshll.u32 %s1145_s6, 4 }
  0x16   : > { %p49_p9 = scmp.eq.s32.totalorder %s46_s5, 0  ;;  %s571_s8 = sshll.u32 %s836_s21, 1 }
  0x17   : > { %s572_s9 = sshll.u32 %s832_s20, 2  ;;  %p951_p10 = pnand %p612_p8, %p924_p5 }
  0x18   : > { %s947_s10 = scalar_select %p49_p9, %s820_s17, %s51_s26  }
  0x19   : > { %s212_s11 = sadd.s32 %s572_s9, %s571_s8  ;;  %s225_s14 = sand.u32 1, %s840_s22  }
  0x1a   : > { %s955_s13 = sshll.u32 %s212_s11, 7  ;;  %s1160_s1 = sld [smem:[#allocation12_spill]] }
  0x1b   : > { %s229_s26 = scalar_lea.vmem [#allocation4], %s942_s7  ;;  %s969_s5 = scalar_lea.sflag [#allocation5], %s225_s14 }
  0x1c   : > { %s240_s28 = sshll.u32 %s229_s26, 4  ;;  %p975_p0 = pneg %p951_p10  ;;  %s966_s28 = int_to_ptr.vmem [resolvable:$true] %s240_s28 }
  0x20   : > { %s962_s30 = scalar_lea.hbm %s1160_s1, %s955_s13  ;;  %s685_s27 = scalar_lea.hbm %s1160_s1, 1024 }
  0x21   : > { %s680_s8 = scalar_lea.hbm %s962_s30, 256  ;;  %p686_p3 = scmp.lt.u32.totalorder %s962_s30, %s1160_s1 }
  0x22   : > { %p681_p13 = scmp.ne.s32.totalorder %s962_s30, %s680_s8  ;;  %p687_p4 = scmp.lt.u32.totalorder %s685_s27, %s680_s8 }
  0x23   : > { %p689_p6 = scmp.lt.u32.totalorder %s680_s8, %s962_s30 }
  0x24   : > { %p683_p1 = pnand %p975_p0, %p681_p13  ;;  %p688_p5 = por %p687_p4, %p686_p3 }
  0x26   : > { %p684_p2 = pneg %p683_p1  ;;  %p690_p8 = por %p689_p6, %p688_p5 }
  0x28   : > { %p691_p9 = pnand %p690_p8, %p684_p2 }
  0x2a   : > { %694 = shalt.err (!%p691_p9)
}
  0x2b   : > { %s695_s14 = scalar_lea.vmem %s966_s28, 256  ;;  %s842_s11 = smov [#allocation4]  }
  0x2c   : > { %p696_p13 = scmp.ne.s32.totalorder %s966_s28, %s695_s14  ;;  %s700_s15 = sshll.u32 %s842_s11, 4  ;;  %s701_s15 = int_to_ptr.vmem [resolvable:$false] %s700_s15 }
  0x2d   : > { %s702_s23 = scalar_lea.vmem %s701_s15, 512  ;;  %p703_p12 = scmp.lt.s32.totalorder %s966_s28, %s701_s15 }
  0x2e   : > { %p698_p1 = pnand %p696_p13, %p975_p0  ;;  %p704_p7 = scmp.lt.s32.totalorder %s702_s23, %s695_s14 }
  0x30   : > { %p699_p11 = pneg %p698_p1  ;;  %p705_p3 = por %p704_p7, %p703_p12 }
  0x32   : > { %p706_p4 = pnand %p705_p3, %p699_p11 }
  0x34   : > { %709 = shalt.err (!%p706_p4)
}
  0x35   : > { %s1146_s8 = smov 128   ;;  %s1148_s27 = smov 8  }
  0x36   : > { %608 = dma.hbm_to_vmem [thread:$0]  (!%p951_p10), %s962_s30, 256, %s966_s28, %s969_s5, %s1146_s8, %s1146_s8, %s1148_s27  }
  0x37   : > { %p1162_p7 = scmp.lt.s32.totalorder %s840_s22, 5  ;;  %p1163_p11 = scmp.ge.s32.totalorder %s840_s22, 1 }
  0x38   : > { %s1014_s15 = scalar_lea.hbm %s1138_s0, %s955_s13  ;;  %s204_s23 = scalar_lea.vmem [#allocation2], %s942_s7 }
  0x39   : > { %p1006_p12 = pnand %p1163_p11, %p1162_p7  ;;  %s215_s6 = sshll.u32 %s204_s23, 4  ;;  %s1017_s6 = int_to_ptr.vmem [resolvable:$true] %s215_s6 }
  0x3a   : > { %s1023_s8 = scalar_lea.hbm %s1140_s2, %s955_s13  ;;  %s1165_s27 = sand.u32 1, %s820_s17  }
  0x3b   : > { %s1164_s26 = scalar_select %p1006_p12, 1, 0 }
  0x3c   : > { %s1027_s1 = scalar_lea.sflag [#allocation3], %s1165_s27  ;;  %s710_s25 = scalar_lea.hbm %s1014_s15, 256 }
  0x3d   : > { %p711_p2 = scmp.ne.s32.totalorder %s1014_s15, %s710_s25  ;;  %s715_s24 = scalar_lea.hbm %s1138_s0, 1024 }
  0x3e   : > { %p716_p8 = scmp.lt.u32.totalorder %s1014_s15, %s1138_s0  ;;  %p717_p9 = scmp.lt.u32.totalorder %s715_s24, %s710_s25 }
  0x3f   : > { %p713_p5 = pnand %p711_p2, %p975_p0  ;;  %p719_p1 = scmp.lt.u32.totalorder %s710_s25, %s1014_s15 }
  0x40   : > { %p718_p13 = por %p717_p9, %p716_p8 }
  0x41   : > { %p714_p6 = pneg %p713_p5 }
  0x42   : > { %p720_p3 = por %p719_p1, %p718_p13 }
  0x44   : > { %p721_p4 = pnand %p720_p3, %p714_p6 }
  0x46   : > { %724 = shalt.err (!%p721_p4)
}
  0x47   : > { %s725_s13 = scalar_lea.vmem %s1017_s6, 256  ;;  %s845_s27 = smov [#allocation2]  }
  0x48   : > { %p726_p7 = scmp.ne.s32.totalorder %s1017_s6, %s725_s13  ;;  %s730_s30 = sshll.u32 %s845_s27, 4  ;;  %s731_s30 = int_to_ptr.vmem [resolvable:$false] %s730_s30 }
  0x49   : > { %s732_s21 = scalar_lea.vmem %s731_s30, 512  ;;  %p733_p5 = scmp.lt.s32.totalorder %s1017_s6, %s731_s30 }
  0x4a   : > { %p728_p11 = pnand %p726_p7, %p975_p0  ;;  %p734_p12 = scmp.lt.s32.totalorder %s732_s21, %s725_s13 }
  0x4c   : > { %p729_p2 = pneg %p728_p11  ;;  %p735_p8 = por %p734_p12, %p733_p5 }
  0x4e   : > { %p736_p9 = pnand %p735_p8, %p729_p2 }
  0x50   : > { %739 = shalt.err (!%p736_p9)
}
  0x51   : > { %s1166_s24 = smov 8   ;;  %s1167_s25 = smov 128  }
  0x52   : > { %605 = dma.hbm_to_vmem [thread:$0]  (!%p951_p10), %s1014_s15, 256, %s1017_s6, %s1027_s1, %s1167_s25, %s1167_s25, %s1166_s24  }
  0x53   : > { %s254_s28 = scalar_lea.vmem [#allocation6], %s942_s7  ;;  %s740_s11 = scalar_lea.hbm %s1023_s8, 256 }
  0x54   : > { %s265_s14 = sshll.u32 %s254_s28, 4  ;;  %p741_p12 = scmp.ne.s32.totalorder %s1023_s8, %s740_s11  ;;  %s1055_s14 = int_to_ptr.vmem [resolvable:$true] %s265_s14 }
  0x55   : > { %s745_s27 = scalar_lea.hbm %s1140_s2, 1024  ;;  %p746_p1 = scmp.lt.u32.totalorder %s1023_s8, %s1140_s2 }
  0x56   : > { %p743_p6 = pnand %p741_p12, %p975_p0  ;;  %p747_p3 = scmp.lt.u32.totalorder %s745_s27, %s740_s11 }
  0x57   : > { %p749_p7 = scmp.lt.u32.totalorder %s740_s11, %s1023_s8 }
  0x58   : > { %p744_p13 = pneg %p743_p6  ;;  %p748_p4 = por %p747_p3, %p746_p1 }
  0x5a   : > { %p750_p11 = por %p749_p7, %p748_p4 }
  0x5c   : > { %p751_p2 = pnand %p750_p11, %p744_p13 }
  0x5e   : > { %754 = shalt.err (!%p751_p2)
}
  0x5f   : > { %s755_s1 = scalar_lea.vmem %s1055_s14, 256  ;;  %s846_s6 = smov [#allocation6]  }
  0x60   : > { %p756_p5 = scmp.ne.s32.totalorder %s1055_s14, %s755_s1  ;;  %s760_s7 = sshll.u32 %s846_s6, 4  ;;  %s761_s7 = int_to_ptr.vmem [resolvable:$false] %s760_s7 }
  0x61   : > { %s762_s15 = scalar_lea.vmem %s761_s7, 512  ;;  %p763_p12 = scmp.lt.s32.totalorder %s1055_s14, %s761_s7 }
  0x62   : > { %p758_p8 = pnand %p756_p5, %p975_p0  ;;  %p764_p6 = scmp.lt.s32.totalorder %s762_s15, %s755_s1 }
  0x64   : > { %p759_p9 = pneg %p758_p8  ;;  %p765_p1 = por %p764_p6, %p763_p12 }
  0x66   : > { %p766_p3 = pnand %p765_p1, %p759_p9 }
  0x68   : > { %769 = shalt.err (!%p766_p3)
}
  0x69   : > { %611 = dma.hbm_to_vmem [thread:$0]  (!%p951_p10), %s1023_s8, 256, %s1055_s14, %s969_s5, %s1167_s25, %s1167_s25, %s1166_s24  }
  0x6a   : > { %p1168_p0 = scmp.ne.s32.totalorder %s1164_s26, 0 }
  0x6b   : > { %s279_s9 = sand.u32 (!%p1168_p0), 1, %s816_s16   ;;  %p1169_p13 = scmp.ne.s32.totalorder (!%p1168_p0), %s1158_s29, 0 }
  0x6c   : > { %277 = sbr.rel (%p1168_p0) target bundleno = 349 (0x15d), region = 32  ;;  %s583_s28 = sshll.u32 (!%p1168_p0), %s279_s9, 4 }
  0x6d   : > { %s280_s11 = scalar_lea.sflag (!%p1168_p0), [#allocation3], %s279_s9  ;;  %s283_s23 = scalar_lea.vmem (!%p1168_p0), [#allocation2], %s583_s28 }
  0x73   : > { %803 = dma.done.wait (%p1169_p13), %s280_s11, 256  }
  0x74   : > { %805 = vsyncadd (%p1169_p13), %s280_s11, 4294967040  ;;  %s1170_s12 = sadd.s32 4294967295, %s840_s22   ;;  %s292_s5 = scalar_lea.vmem [#allocation4], %s583_s28 }
  0x75   : > { %s288_s13 = sand.u32 1, %s1170_s12  }
  0x76   : > { %s289_s27 = scalar_lea.sflag [#allocation5], %s288_s13 }
  0x77   : > { %807 = dma.done.wait (%p1169_p13), %s289_s27, 512  }
  0x78   : > { %809 = vsyncadd (%p1169_p13), %s289_s27, 4294966784  ;;  %p342_p10 = scmp.lt.s32.totalorder %s828_s19, 1  ;;  %p350_p4 = scmp.eq.s32.totalorder %s824_s18, 0 }
  0x79   : > { %s301_s1 = scalar_lea.vmem [#allocation6], %s583_s28  ;;  %v847_v0 = vmov (%p350_p4), 0.0  }
  0x7a   : > { %s1186_s19 = smov (!%p342_p10, %s828_s19), 1  ;;  %355 = sbr.rel (!%p350_p4) target bundleno = 129 (0x81), region = 48 }
  0x7b   : > { %s586_s8 = sshll.u32 %s1186_s19, 3 }
  0x7c   : > { %s1101_s25 = scalar_lea.vmem %s1141_s3, %s586_s8  ;;  %s1106_s21 = scalar_lea.vmem %s1142_s4, %s586_s8 }
  0x7d   : > { %356 = vst [vmem:[%s1101_s25] sm:$0xff] (%p350_p4), %v847_v0  ;;  %357 = vst [vmem:[%s1106_s21] sm:$0xff] (%p350_p4), %v847_v0 }
  0x81 PF: > { %v358_v1 = vld [vmem:[%s283_s23] sm:$0xff]  ;;  %v359_v2 = vld [vmem:[%s283_s23 + $0x8] sm:$0xff] }
  0x82   : > { %v360_v3 = vld [vmem:[%s292_s5] sm:$0xff]  ;;  %v361_v4 = vld [vmem:[%s292_s5 + $0x8] sm:$0xff] }
  0x83   : > { %v365_v5 = vsub.f32 %v360_v3, %v358_v1  ;;  %v362_v6 = vld [vmem:[%s301_s1] sm:$0xff]  ;;  %v363_v7 = vld [vmem:[%s301_s1 + $0x8] sm:$0xff]  ;;  %v366_v8 = vsub.f32 %v361_v4, %v359_v2 }
  0x84   : > { %v383_v11 = vmul.f32 %v362_v6, %v362_v6  ;;  %v384_v12 = vmul.f32 %v363_v7, %v363_v7  ;;  %v364_v29 = vld [vmem:[%s1101_s25] sm:$0xff] }
  0x85   : > { %v367_v9 = vand.u32 2147483647, %v365_v5  ;;  %v368_v10 = vand.u32 2147483647, %v366_v8  ;;  %v382_v32 = vld [vmem:[%s1106_s21] sm:$0xff] }
  0x86   : > { %v385_v14 = vadd.f32 %v384_v12, %v383_v11 }
  0x87   : > { %v369_v13 = vadd.f32 %v368_v10, %v367_v9 }
  0x89   : > { %370 = vadd.xlane.f32.xlu0 %v369_v13 }
  0x8d   : > { %386 = vadd.xlane.f32.xlu0 %v385_v14 }
 0x116   : > { %v371_v15 = vpop.xlane.xlu0 %370 }
 0x117   : > { %v372_v16 = vrot.slane %v371_v15, 4 }
 0x119   : > { %v373_v17 = vadd.f32 %v372_v16, %v371_v15 }
 0x11a   : > { %v387_v18 = vpop.xlane.xlu0 %386 }
 0x11b   : > { %v374_v19 = vrot.slane %v373_v17, 2  ;;  %v388_v20 = vrot.slane %v387_v18, 4 }
 0x11d   : > { %v389_v21 = vadd.f32 %v388_v20, %v387_v18  ;;  %v375_v22 = vadd.f32 %v374_v19, %v373_v17 }
 0x11f   : > { %v390_v23 = vrot.slane %v389_v21, 2  ;;  %v376_v24 = vrot.slane %v375_v22, 1 }
 0x121   : > { %v391_v25 = vadd.f32 %v390_v23, %v389_v21  ;;  %v377_v26 = vadd.f32 %v376_v24, %v375_v22 }
 0x123   : > { %592 = vpush %v377_v26  ;;  %v392_v27 = vrot.slane %v391_v25, 1 }
 0x125   : > { %v393_v28 = vadd.f32 %v392_v27, %v391_v25 }
 0x127   : > { %594 = vpush %v393_v28 }
 0x154   : > { %s593_s18 = spop %592 }
 0x155   : > { %v379_v30 = vstv %s593_s18 }
 0x156   : > { %v380_v31 = vadd.f32 %v379_v30, %v364_v29 }
 0x158   : > { %381 = vst [vmem:[%s1101_s25] sm:$0xff] %v380_v31  ;;  %s595_s19 = spop %594 }
 0x159   : > { %v395_v33 = vstv %s595_s19 }
 0x15a   : > { %v396_v34 = vadd.f32 %v395_v33, %v382_v32 }
 0x15c   : > { %397 = vst [vmem:[%s1106_s21] sm:$0xff] %v396_v34 }
 0x15d PF: > { %s21_s22 = sadd.s32 1, %s840_s22   ;;  %s1171_s19 = sld [smem:[#allocation9_spill]] }
 0x15e   : > { %p18_p7 = scmp.ge.s32.totalorder %s21_s22, 6   ;;  %s1172_s29 = sld [smem:[#allocation10_spill]] }
 0x15f   : > { %s1173_s21 = sld [smem:[#allocation11_spill]]  ;;  %s1174_s15 = smov %s816_s16 }
 0x160   : > { %s1175_s16 = smov %s820_s17  ;;  %s1176_s17 = smov %s947_s10 }
 0x161   : > { %s1177_s18 = smov %s832_s20  ;;  %20 = sbr.rel (!%p18_p7) target bundleno = 9 (0x9), region = 112 }
 0x164   : > { %s1178_s20 = smov %s1172_s29 }
 0x168   :  { %431 = vsyncpa [#allocation3], 1 }
 0x169   :  { %433 = vsyncpa [#allocation3 + $0x1], 1 }
 0x16a   :  { %434 = vsyncpa [#allocation5], 1 }
 0x16b   :  { %436 = vsyncpa [#allocation5 + $0x1], 1 }

</bundles_post_ra>
